<compile_context>
chip_gen: v7x
topology: tpu7x:2x2x1
jax: 0.10.0
libtpu: 0.0.40
codegen_flags: <defaults>
</compile_context>

<pallas_src>
import math

import jax
import jax.numpy as jnp
from jax import lax
from jax.experimental import pallas as pl
from jax.experimental.pallas import tpu as pltpu

# ---- module hyperparameters (match the PyTorch source) ----
N_EMBD = 64
BLOCK_SIZE = 32                     # max sequence length for the causal mask
NUM_HEADS = 4
HEAD_SIZE = N_EMBD // NUM_HEADS     # 16; concat of heads equals n_embd
DROPOUT = 0.0                       # identity at p=0.0 (no-op in forward)


def _cdiv(a, b):
    return -(-a // b)


def _make_kernel(TB, T, C, H, hs, compute_dtype):
    """Build a kernel closure for a (TB sequences x T tokens) block."""
    # exact reciprocal on the f32 reference path, EUP approx on the bf16 path
    approx_recip = jnp.dtype(compute_dtype).itemsize < 4

    def kernel(x_ref, wqkv_ref, wpT_ref, bp_ref, o_ref):
        # x_ref:    (M, C)   activations, f32 (cast in-kernel)
        # wqkv_ref: (C, 3C)  fused, pre-transposed [Wq^T*scale | Wk^T | Wv^T]
        # wpT_ref:  (C, C)   pre-transposed projection weight
        # bp_ref:   (1, C)   projection bias (f32)
        # o_ref:    (M, C)   output
        x2 = x_ref[...].astype(compute_dtype)                          # (M, C)

        # Fused QKV projection (scale already folded into the Q columns);
        # f32 MXU accumulation, then immediately narrowed to bound qkv's
        # live range across the unrolled head loop.
        qkv = jnp.dot(x2, wqkv_ref[...],
                      preferred_element_type=jnp.float32).astype(compute_dtype)  # (M, 3C)
        qkv3 = qkv.reshape(TB, T, 3 * C)                               # lane dim unchanged

        # Additive causal mask (finite large-negative; diagonal always allowed).
        row = lax.broadcasted_iota(jnp.int32, (T, T), 0)
        col = lax.broadcasted_iota(jnp.int32, (T, T), 1)
        neg = jnp.where(col <= row, 0.0, -1e30).astype(jnp.float32)[None]  # (1, T, T)

        head_outs = []
        for h in range(H):                                             # H = 4, static unroll
            q = qkv3[:, :, h * hs:(h + 1) * hs]                        # (TB, T, hs)
            k = qkv3[:, :, C + h * hs:C + (h + 1) * hs]
            v = qkv3[:, :, 2 * C + h * hs:2 * C + (h + 1) * hs]

            s = jnp.einsum('btd,bsd->bts', q, k,
                           preferred_element_type=jnp.float32) + neg   # f32 scores
            m = jnp.max(s, axis=-1, keepdims=True)
            e = jnp.exp(s - m)                                         # un-normalized probs
            inv = pl.reciprocal(jnp.sum(e, axis=-1, keepdims=True),
                                approx=approx_recip)                    # (TB, T, 1)
            oh = jnp.einsum('bts,bsd->btd', e.astype(compute_dtype), v,
                            preferred_element_type=jnp.float32)        # (TB, T, hs) f32
            head_outs.append((oh * inv).astype(compute_dtype))         # deferred softmax norm

        # Head concat (XLU lane merge) -> one K=64 output-projection matmul.
        cat = jnp.concatenate(head_outs, axis=-1).reshape(TB * T, C)   # (M, C)
        out = jnp.dot(cat, wpT_ref[...],
                      preferred_element_type=jnp.float32) + bp_ref[...]
        o_ref[...] = out.astype(o_ref.dtype)

    return kernel


def parallel_multihead_attention(x, wq, wk, wv, wp, bp, *,
                                 compute_dtype=jnp.bfloat16, rows_per_step=2048):
    """x: (B, T, C) float32; wq/wk/wv: (H, head_size, C); wp: (C, C); bp: (C,).

    Returns (B, T, C) in x.dtype. `compute_dtype` controls matmul-operand dtype
    (bf16 default for MXU rate; softmax and accumulation stay f32).
    """
    B, T, C = x.shape
    assert C == N_EMBD and T <= BLOCK_SIZE
    H, hs = NUM_HEADS, HEAD_SIZE
    scale = hs ** (-0.5)

    # --- fuse + pre-transpose weights once (nn.Linear: y = x @ W^T); fold the
    # 1/sqrt(head_size) score scale into the Q columns so the kernel has no
    # per-score multiply. ---
    wqT = wq.reshape(C, C).T * scale         # heads stacked along out_features
    wkT = wk.reshape(C, C).T
    wvT = wv.reshape(C, C).T
    wqkvT = jnp.concatenate([wqT, wkT, wvT], axis=1).astype(compute_dtype)  # (C, 3C)
    wpT = wp.T.astype(compute_dtype)                                        # (C, C)
    bp2 = bp.reshape(1, C).astype(jnp.float32)

    # --- batch folding: ~rows_per_step rows per grid step, but keep >= 2 grid
    # steps when B allows (both v7x TensorCores get work under "parallel");
    # blocks stay sublane-aligned (x16 for packed bf16, x8 for f32). ---
    TB = max(1, _cdiv(rows_per_step, T))
    TB = min(TB, B)
    if B >= 2:
        TB = min(TB, _cdiv(B, 2))
    align = 16 if jnp.dtype(compute_dtype).itemsize < 4 else 8
    if (TB * T) % align != 0:
        step = align // math.gcd(T, align)
        TB = _cdiv(TB, step) * step
    nb = _cdiv(B, TB)
    B_pad = nb * TB

    xp = x if B_pad == B else jnp.pad(x, ((0, B_pad - B), (0, 0), (0, 0)))
    x2d = xp.reshape(B_pad * T, C)        # NO wrapper-side dtype cast: kernel casts in VMEM

    M_blk = TB * T
    kernel = _make_kernel(TB, T, C, H, hs, compute_dtype)

    out2d = pl.pallas_call(
        kernel,
        out_shape=jax.ShapeDtypeStruct((B_pad * T, C), x.dtype),
        grid_spec=pltpu.PrefetchScalarGridSpec(
            num_scalar_prefetch=0,
            grid=(nb,),
            in_specs=[
                pl.BlockSpec((M_blk, C), lambda i: (i, 0)),      # activations (f32)
                pl.BlockSpec((C, 3 * C), lambda i: (0, 0)),      # fused [Wq^T*s | Wk^T | Wv^T]
                pl.BlockSpec((C, C), lambda i: (0, 0)),          # Wp^T
                pl.BlockSpec((1, C), lambda i: (0, 0)),          # projection bias
            ],
            out_specs=pl.BlockSpec((M_blk, C), lambda i: (i, 0)),
        ),
        compiler_params=pltpu.CompilerParams(
            dimension_semantics=("parallel",),
        ),
    )(x2d, wqkvT, wpT, bp2)

    return out2d.reshape(B_pad, T, C)[:B]


def _reference(x, wq, wk, wv, wp, bp):
    """Pure-JAX reference matching the PyTorch forward semantics (f32)."""
    B, T, C = x.shape
    scale = HEAD_SIZE ** (-0.5)
    mask = jnp.tril(jnp.ones((T, T), dtype=bool))
    outs = []
    for h in range(NUM_HEADS):
        q = x @ wq[h].T
        k = x @ wk[h].T
        v = x @ wv[h].T
        s = jnp.einsum('btd,bsd->bts', q, k) * scale
        s = jnp.where(mask, s, -jnp.inf)
        p = jax.nn.softmax(s, axis=-1)
        outs.append(p @ v)
    cat = jnp.concatenate(outs, axis=-1)
    return cat @ wp.T + bp


if __name__ == "__main__":
    key = jax.random.PRNGKey(0)
    kx, kq, kk, kv, kp, kb = jax.random.split(key, 6)

    B, T, C = 2, 8, N_EMBD
    x = jax.random.normal(kx, (B, T, C), dtype=jnp.float32)

    # deterministic synthetic parameters (nn.Linear-like scale)
    lim = 1.0 / math.sqrt(N_EMBD)
    wq = jax.random.uniform(kq, (NUM_HEADS, HEAD_SIZE, N_EMBD), jnp.float32, -lim, lim)
    wk = jax.random.uniform(kk, (NUM_HEADS, HEAD_SIZE, N_EMBD), jnp.float32, -lim, lim)
    wv = jax.random.uniform(kv, (NUM_HEADS, HEAD_SIZE, N_EMBD), jnp.float32, -lim, lim)
    wp = jax.random.uniform(kp, (N_EMBD, N_EMBD), jnp.float32, -lim, lim)
    bp = jax.random.uniform(kb, (N_EMBD,), jnp.float32, -lim, lim)

    ref = _reference(x, wq, wk, wv, wp, bp)

    # f32 matmul-operand path: strict check against the reference.
    out_f32 = parallel_multihead_attention(x, wq, wk, wv, wp, bp,
                                           compute_dtype=jnp.float32)
    out_f32 = jax.block_until_ready(out_f32)
    assert out_f32.shape == (B, T, C)
    assert jnp.allclose(out_f32, ref, atol=1e-3, rtol=1e-3), "f32 path mismatch vs reference"

    # default bf16 matmul-operand path (f32 softmax + accumulation): looser check.
    out_bf16 = parallel_multihead_attention(x, wq, wk, wv, wp, bp)
    out_bf16 = jax.block_until_ready(out_bf16)
    assert out_bf16.shape == (B, T, C)
    assert jnp.allclose(out_bf16, ref, atol=5e-2, rtol=5e-2), "bf16 path mismatch vs reference"

    # exercise batch folding / padding / multi-step "parallel" grid at a
    # slightly larger (still small) shape.
    B2, T2 = 48, 32
    x2 = jax.random.normal(kx, (B2, T2, C), dtype=jnp.float32)
    ref2 = _reference(x2, wq, wk, wv, wp, bp)
    out2 = jax.block_until_ready(parallel_multihead_attention(x2, wq, wk, wv, wp, bp))
    assert out2.shape == (B2, T2, C)
    assert jnp.allclose(out2, ref2, atol=5e-2, rtol=5e-2), "folded-batch path mismatch"

    print("KERNEL_OK")
</pallas_src>

<mosaic_0001>
module attributes {stable_mosaic.version = 11 : i64} {
  func.func @kernel(%arg0: i32, %arg1: memref<8x64xf32, #tpu.memory_space<vmem>>, %arg2: memref<64x192xf32, #tpu.memory_space<vmem>>, %arg3: memref<64x64xf32, #tpu.memory_space<vmem>>, %arg4: memref<1x64xf32, #tpu.memory_space<vmem>>, %arg5: memref<8x64xf32, #tpu.memory_space<vmem>>) attributes {dimension_semantics = [#tpu.dimension_semantics<parallel>], iteration_bounds = array<i64: 2>, scalar_prefetch = 0 : i64, scratch_operands = 0 : i64, tpu.core_type = #tpu.core_type<tc>, window_params = [{transform_indices = @transform_0, window_bounds = array<i64: 8, 64>}, {pipeline_mode = #tpu.pipeline_mode<synchronous>, transform_indices = @transform_1, window_bounds = array<i64: 64, 192>}, {pipeline_mode = #tpu.pipeline_mode<synchronous>, transform_indices = @transform_2, window_bounds = array<i64: 64, 64>}, {pipeline_mode = #tpu.pipeline_mode<synchronous>, transform_indices = @transform_3, window_bounds = array<i64: 1, 64>}, {transform_indices = @transform_4, window_bounds = array<i64: 8, 64>}]} {
    %c0 = arith.constant 0 : index
    %c0_0 = arith.constant 0 : index
    %0 = vector.load %arg1[%c0, %c0_0] : memref<8x64xf32, #tpu.memory_space<vmem>>, vector<8x64xf32>
    %c0_1 = arith.constant 0 : index
    %c0_2 = arith.constant 0 : index
    %1 = vector.load %arg2[%c0_1, %c0_2] : memref<64x192xf32, #tpu.memory_space<vmem>>, vector<64x192xf32>
    %cst = arith.constant dense<0.000000e+00> : vector<8x192xf32>
    %2 = tpu.matmul %0, %1, %cst {dimension_numbers = #tpu.dot_dimension_numbers<[1], [0], [0], [1], [0, 0, 1, 1], [], []>} : vector<8x64xf32>, vector<64x192xf32>, vector<8x192xf32> -> vector<8x192xf32>
    %3 = vector.shape_cast %2 : vector<8x192xf32> to vector<1x8x192xf32>
    %4 = tpu.iota {dimensions = array<i32: 0>} : vector<8x8xi32>
    %5 = tpu.iota {dimensions = array<i32: 1>} : vector<8x8xi32>
    %6 = arith.cmpi sle, %5, %4 : vector<8x8xi32>
    %cst_3 = arith.constant 0.000000e+00 : f32
    %cst_4 = arith.constant -1.000000e+30 : f32
    %7 = vector.broadcast %cst_3 : f32 to vector<8x8xf32>
    %8 = vector.broadcast %cst_4 : f32 to vector<8x8xf32>
    %9 = arith.select %6, %7, %8 : vector<8x8xi1>, vector<8x8xf32>
    %10 = vector.shape_cast %9 : vector<8x8xf32> to vector<1x8x8xf32>
    %11 = vector.extract_strided_slice %3 {offsets = [0, 0, 0], sizes = [1, 8, 16], strides = [1, 1, 1]} : vector<1x8x192xf32> to vector<1x8x16xf32>
    %12 = vector.extract_strided_slice %3 {offsets = [0, 0, 64], sizes = [1, 8, 16], strides = [1, 1, 1]} : vector<1x8x192xf32> to vector<1x8x16xf32>
    %13 = vector.extract_strided_slice %3 {offsets = [0, 0, 128], sizes = [1, 8, 16], strides = [1, 1, 1]} : vector<1x8x192xf32> to vector<1x8x16xf32>
    "tpu.trace_start"() <{level = 10 : i32, message = "btd,bsd->bts"}> : () -> ()
    %cst_5 = arith.constant dense<0.000000e+00> : vector<1x8x8xf32>
    %14 = tpu.matmul %11, %12, %cst_5 {dimension_numbers = #tpu.dot_dimension_numbers<[2], [2], [1], [1], [0, 0, 0, 1, 1, 1], [0], [0]>} : vector<1x8x16xf32>, vector<1x8x16xf32>, vector<1x8x8xf32> -> vector<1x8x8xf32>
    "tpu.trace_stop"() : () -> ()
    %15 = arith.addf %14, %10 : vector<1x8x8xf32>
    %cst_6 = arith.constant dense<0xFF800000> : vector<1x8xf32>
    %16 = vector.multi_reduction <maximumf>, %15, %cst_6 [2] : vector<1x8x8xf32> to vector<1x8xf32>
    %17 = vector.shape_cast %16 : vector<1x8xf32> to vector<1x8x1xf32>
    %18 = vector.broadcast %17 : vector<1x8x1xf32> to vector<1x8x8xf32>
    %19 = arith.subf %15, %18 : vector<1x8x8xf32>
    %20 = math.exp %19 : vector<1x8x8xf32>
    %cst_7 = arith.constant dense<0.000000e+00> : vector<1x8xf32>
    %21 = vector.multi_reduction <add>, %20, %cst_7 [2] : vector<1x8x8xf32> to vector<1x8xf32>
    %22 = vector.shape_cast %21 : vector<1x8xf32> to vector<1x8x1xf32>
    %23 = tpu.reciprocal %22 : vector<1x8x1xf32> -> vector<1x8x1xf32>
    "tpu.trace_start"() <{level = 10 : i32, message = "bts,bsd->btd"}> : () -> ()
    %cst_8 = arith.constant dense<0.000000e+00> : vector<1x8x16xf32>
    %24 = tpu.matmul %20, %13, %cst_8 {dimension_numbers = #tpu.dot_dimension_numbers<[2], [1], [1], [2], [0, 0, 0, 1, 1, 2], [0], [0]>} : vector<1x8x8xf32>, vector<1x8x16xf32>, vector<1x8x16xf32> -> vector<1x8x16xf32>
    "tpu.trace_stop"() : () -> ()
    %25 = vector.broadcast %23 : vector<1x8x1xf32> to vector<1x8x16xf32>
    %26 = arith.mulf %24, %25 : vector<1x8x16xf32>
    %27 = vector.extract_strided_slice %3 {offsets = [0, 0, 16], sizes = [1, 8, 16], strides = [1, 1, 1]} : vector<1x8x192xf32> to vector<1x8x16xf32>
    %28 = vector.extract_strided_slice %3 {offsets = [0, 0, 80], sizes = [1, 8, 16], strides = [1, 1, 1]} : vector<1x8x192xf32> to vector<1x8x16xf32>
    %29 = vector.extract_strided_slice %3 {offsets = [0, 0, 144], sizes = [1, 8, 16], strides = [1, 1, 1]} : vector<1x8x192xf32> to vector<1x8x16xf32>
    "tpu.trace_start"() <{level = 10 : i32, message = "btd,bsd->bts"}> : () -> ()
    %cst_9 = arith.constant dense<0.000000e+00> : vector<1x8x8xf32>
    %30 = tpu.matmul %27, %28, %cst_9 {dimension_numbers = #tpu.dot_dimension_numbers<[2], [2], [1], [1], [0, 0, 0, 1, 1, 1], [0], [0]>} : vector<1x8x16xf32>, vector<1x8x16xf32>, vector<1x8x8xf32> -> vector<1x8x8xf32>
    "tpu.trace_stop"() : () -> ()
    %31 = arith.addf %30, %10 : vector<1x8x8xf32>
    %cst_10 = arith.constant dense<0xFF800000> : vector<1x8xf32>
    %32 = vector.multi_reduction <maximumf>, %31, %cst_10 [2] : vector<1x8x8xf32> to vector<1x8xf32>
    %33 = vector.shape_cast %32 : vector<1x8xf32> to vector<1x8x1xf32>
    %34 = vector.broadcast %33 : vector<1x8x1xf32> to vector<1x8x8xf32>
    %35 = arith.subf %31, %34 : vector<1x8x8xf32>
    %36 = math.exp %35 : vector<1x8x8xf32>
    %cst_11 = arith.constant dense<0.000000e+00> : vector<1x8xf32>
    %37 = vector.multi_reduction <add>, %36, %cst_11 [2] : vector<1x8x8xf32> to vector<1x8xf32>
    %38 = vector.shape_cast %37 : vector<1x8xf32> to vector<1x8x1xf32>
    %39 = tpu.reciprocal %38 : vector<1x8x1xf32> -> vector<1x8x1xf32>
    "tpu.trace_start"() <{level = 10 : i32, message = "bts,bsd->btd"}> : () -> ()
    %cst_12 = arith.constant dense<0.000000e+00> : vector<1x8x16xf32>
    %40 = tpu.matmul %36, %29, %cst_12 {dimension_numbers = #tpu.dot_dimension_numbers<[2], [1], [1], [2], [0, 0, 0, 1, 1, 2], [0], [0]>} : vector<1x8x8xf32>, vector<1x8x16xf32>, vector<1x8x16xf32> -> vector<1x8x16xf32>
    "tpu.trace_stop"() : () -> ()
    %41 = vector.broadcast %39 : vector<1x8x1xf32> to vector<1x8x16xf32>
    %42 = arith.mulf %40, %41 : vector<1x8x16xf32>
    %43 = vector.extract_strided_slice %3 {offsets = [0, 0, 32], sizes = [1, 8, 16], strides = [1, 1, 1]} : vector<1x8x192xf32> to vector<1x8x16xf32>
    %44 = vector.extract_strided_slice %3 {offsets = [0, 0, 96], sizes = [1, 8, 16], strides = [1, 1, 1]} : vector<1x8x192xf32> to vector<1x8x16xf32>
    %45 = vector.extract_strided_slice %3 {offsets = [0, 0, 160], sizes = [1, 8, 16], strides = [1, 1, 1]} : vector<1x8x192xf32> to vector<1x8x16xf32>
    "tpu.trace_start"() <{level = 10 : i32, message = "btd,bsd->bts"}> : () -> ()
    %cst_13 = arith.constant dense<0.000000e+00> : vector<1x8x8xf32>
    %46 = tpu.matmul %43, %44, %cst_13 {dimension_numbers = #tpu.dot_dimension_numbers<[2], [2], [1], [1], [0, 0, 0, 1, 1, 1], [0], [0]>} : vector<1x8x16xf32>, vector<1x8x16xf32>, vector<1x8x8xf32> -> vector<1x8x8xf32>
    "tpu.trace_stop"() : () -> ()
    %47 = arith.addf %46, %10 : vector<1x8x8xf32>
    %cst_14 = arith.constant dense<0xFF800000> : vector<1x8xf32>
    %48 = vector.multi_reduction <maximumf>, %47, %cst_14 [2] : vector<1x8x8xf32> to vector<1x8xf32>
    %49 = vector.shape_cast %48 : vector<1x8xf32> to vector<1x8x1xf32>
    %50 = vector.broadcast %49 : vector<1x8x1xf32> to vector<1x8x8xf32>
    %51 = arith.subf %47, %50 : vector<1x8x8xf32>
    %52 = math.exp %51 : vector<1x8x8xf32>
    %cst_15 = arith.constant dense<0.000000e+00> : vector<1x8xf32>
    %53 = vector.multi_reduction <add>, %52, %cst_15 [2] : vector<1x8x8xf32> to vector<1x8xf32>
    %54 = vector.shape_cast %53 : vector<1x8xf32> to vector<1x8x1xf32>
    %55 = tpu.reciprocal %54 : vector<1x8x1xf32> -> vector<1x8x1xf32>
    "tpu.trace_start"() <{level = 10 : i32, message = "bts,bsd->btd"}> : () -> ()
    %cst_16 = arith.constant dense<0.000000e+00> : vector<1x8x16xf32>
    %56 = tpu.matmul %52, %45, %cst_16 {dimension_numbers = #tpu.dot_dimension_numbers<[2], [1], [1], [2], [0, 0, 0, 1, 1, 2], [0], [0]>} : vector<1x8x8xf32>, vector<1x8x16xf32>, vector<1x8x16xf32> -> vector<1x8x16xf32>
    "tpu.trace_stop"() : () -> ()
    %57 = vector.broadcast %55 : vector<1x8x1xf32> to vector<1x8x16xf32>
    %58 = arith.mulf %56, %57 : vector<1x8x16xf32>
    %59 = vector.extract_strided_slice %3 {offsets = [0, 0, 48], sizes = [1, 8, 16], strides = [1, 1, 1]} : vector<1x8x192xf32> to vector<1x8x16xf32>
    %60 = vector.extract_strided_slice %3 {offsets = [0, 0, 112], sizes = [1, 8, 16], strides = [1, 1, 1]} : vector<1x8x192xf32> to vector<1x8x16xf32>
    %61 = vector.extract_strided_slice %3 {offsets = [0, 0, 176], sizes = [1, 8, 16], strides = [1, 1, 1]} : vector<1x8x192xf32> to vector<1x8x16xf32>
    "tpu.trace_start"() <{level = 10 : i32, message = "btd,bsd->bts"}> : () -> ()
    %cst_17 = arith.constant dense<0.000000e+00> : vector<1x8x8xf32>
    %62 = tpu.matmul %59, %60, %cst_17 {dimension_numbers = #tpu.dot_dimension_numbers<[2], [2], [1], [1], [0, 0, 0, 1, 1, 1], [0], [0]>} : vector<1x8x16xf32>, vector<1x8x16xf32>, vector<1x8x8xf32> -> vector<1x8x8xf32>
    "tpu.trace_stop"() : () -> ()
    %63 = arith.addf %62, %10 : vector<1x8x8xf32>
    %cst_18 = arith.constant dense<0xFF800000> : vector<1x8xf32>
    %64 = vector.multi_reduction <maximumf>, %63, %cst_18 [2] : vector<1x8x8xf32> to vector<1x8xf32>
    %65 = vector.shape_cast %64 : vector<1x8xf32> to vector<1x8x1xf32>
    %66 = vector.broadcast %65 : vector<1x8x1xf32> to vector<1x8x8xf32>
    %67 = arith.subf %63, %66 : vector<1x8x8xf32>
    %68 = math.exp %67 : vector<1x8x8xf32>
    %cst_19 = arith.constant dense<0.000000e+00> : vector<1x8xf32>
    %69 = vector.multi_reduction <add>, %68, %cst_19 [2] : vector<1x8x8xf32> to vector<1x8xf32>
    %70 = vector.shape_cast %69 : vector<1x8xf32> to vector<1x8x1xf32>
    %71 = tpu.reciprocal %70 : vector<1x8x1xf32> -> vector<1x8x1xf32>
    "tpu.trace_start"() <{level = 10 : i32, message = "bts,bsd->btd"}> : () -> ()
    %cst_20 = arith.constant dense<0.000000e+00> : vector<1x8x16xf32>
    %72 = tpu.matmul %68, %61, %cst_20 {dimension_numbers = #tpu.dot_dimension_numbers<[2], [1], [1], [2], [0, 0, 0, 1, 1, 2], [0], [0]>} : vector<1x8x8xf32>, vector<1x8x16xf32>, vector<1x8x16xf32> -> vector<1x8x16xf32>
    "tpu.trace_stop"() : () -> ()
    %73 = vector.broadcast %71 : vector<1x8x1xf32> to vector<1x8x16xf32>
    %74 = arith.mulf %72, %73 : vector<1x8x16xf32>
    %75 = tpu.concatenate %26, %42, %58, %74 in 2 : vector<1x8x16xf32>, vector<1x8x16xf32>, vector<1x8x16xf32>, vector<1x8x16xf32> -> vector<1x8x64xf32>
    %76 = vector.shape_cast %75 : vector<1x8x64xf32> to vector<8x64xf32>
    %c0_21 = arith.constant 0 : index
    %c0_22 = arith.constant 0 : index
    %77 = vector.load %arg3[%c0_21, %c0_22] : memref<64x64xf32, #tpu.memory_space<vmem>>, vector<64x64xf32>
    %cst_23 = arith.constant dense<0.000000e+00> : vector<8x64xf32>
    %78 = tpu.matmul %76, %77, %cst_23 {dimension_numbers = #tpu.dot_dimension_numbers<[1], [0], [0], [1], [0, 0, 1, 1], [], []>} : vector<8x64xf32>, vector<64x64xf32>, vector<8x64xf32> -> vector<8x64xf32>
    %c0_24 = arith.constant 0 : index
    %c0_25 = arith.constant 0 : index
    %79 = vector.load %arg4[%c0_24, %c0_25] : memref<1x64xf32, #tpu.memory_space<vmem>>, vector<1x64xf32>
    %80 = vector.broadcast %79 : vector<1x64xf32> to vector<8x64xf32>
    %81 = arith.addf %78, %80 : vector<8x64xf32>
    %c0_26 = arith.constant 0 : index
    %c0_27 = arith.constant 0 : index
    %82 = vector.load %arg5[%c0_26, %c0_27] : memref<8x64xf32, #tpu.memory_space<vmem>>, vector<8x64xf32>
    tpu.vector_store %arg5[%c0_26, %c0_27], %81 {strides = array<i32>} : memref<8x64xf32, #tpu.memory_space<vmem>>, vector<8x64xf32>,
    return
  }
  func.func @transform_0(%arg0: i32) -> (i32, i32) {
    %c0_i32 = arith.constant 0 : i32
    %c0_i32_0 = arith.constant 0 : i32
    return %arg0, %c0_i32 : i32, i32
  }
  func.func @transform_1(%arg0: i32) -> (i32, i32) {
    %c0_i32 = arith.constant 0 : i32
    %c0_i32_0 = arith.constant 0 : i32
    %c0_i32_1 = arith.constant 0 : i32
    return %c0_i32, %c0_i32_0 : i32, i32
  }
  func.func @transform_2(%arg0: i32) -> (i32, i32) {
    %c0_i32 = arith.constant 0 : i32
    %c0_i32_0 = arith.constant 0 : i32
    %c0_i32_1 = arith.constant 0 : i32
    return %c0_i32, %c0_i32_0 : i32, i32
  }
  func.func @transform_3(%arg0: i32) -> (i32, i32) {
    %c0_i32 = arith.constant 0 : i32
    %c0_i32_0 = arith.constant 0 : i32
    %c0_i32_1 = arith.constant 0 : i32
    return %c0_i32, %c0_i32_0 : i32, i32
  }
  func.func @transform_4(%arg0: i32) -> (i32, i32) {
    %c0_i32 = arith.constant 0 : i32
    %c0_i32_0 = arith.constant 0 : i32
    return %arg0, %c0_i32 : i32, i32
  }
}

</mosaic_0001>

<bundles_post_ra>
// kernel: tpu_custom_call.1
= control target key start
LH: loop header
LB: loop body
LE: loop exit
PB: predicated region body
PF: predicated region fallthrough
CT: control target
= control target key end

     0   :  { %9 = vsyncpa [#allocation3], 0  ;;  %s1966_s0 = inlined_call_operand.hbm [shape: f32[16,64], index: 0, kind: input, shape index: {}]   ;;  %s1967_s1 = inlined_call_operand.hbm [shape: f32[64,192], index: 1, kind: input, shape index: {}]   ;;  %s1968_s2 = inlined_call_operand.hbm [shape: f32[64,64], index: 2, kind: input, shape index: {}]   ;;  %s1969_s3 = inlined_call_operand.vmem [shape: f32[1,64], index: 3, kind: input, shape index: {}]   ;;  %s1970_s4 = inlined_call_operand.hbm [shape: f32[16,64], index: 4, kind: output, shape index: {}]  }
   0x1   :  { %11 = vsyncpa [#allocation3 + $0x1], 0 }
   0x2   :  { %12 = vsyncpa [#allocation6], 0 }
   0x3   :  { %13 = vsyncpa [#allocation4], 0 }
   0x4   :  { %15 = vsyncpa [#allocation4 + $0x1], 0  ;;  %s1651_s15 = smov 0   ;;  %s1653_s16 = smov 0  }
   0x5   :  { %s1655_s17 = smov 0   ;;  %s1657_s18 = smov 0  }
   0x6 LB: > { %s1672_s19 = sadd.s32 4294967295, %s1605_s18   ;;  %s1208_s20 = sadd.s32 4294967294, %s1605_s18   ;;  %s1605_s18 = sphi %s1657_s18, %s1990_s18   ;;  %s1601_s17 = sphi %s1655_s17, %s1989_s17   ;;  %s1597_s16 = sphi %s1653_s16, %s1988_s16   ;;  %s1593_s15 = sphi %s1651_s15, %s1987_s15  }
   0x7   : > { %p41_p0 = scmp.ne.s32.totalorder %s1597_s16, %s1593_s15  ;;  %p1971_p1 = scmp.eq.s32.totalorder %s1672_s19, 0 }
   0x8   : > { %p134_p3 = scmp.eq.s32.totalorder %s1208_s20, 1  ;;  %p1209_p5 = scmp.ge.s32.totalorder %s1605_s18, 1 }
   0x9   : > { %p1681_p4 = por %p1971_p1, %p41_p0  ;;  %p141_p7 = scmp.lt.s32.totalorder %s1605_s18, 3 }
   0xa   : > { %p1686_p6 = por %p134_p3, %p41_p0  ;;  %s1607_s24 = smov [#allocation5]  }
   0xb   : > { %s1974_s21 = scalar_select %p1681_p4, 1, 0 }
   0xc   : > { %s1975_s22 = scalar_select %p1686_p6, 1, 0 }
   0xd   : > { %p1691_p8 = pnand %p1209_p5, %p141_p7  ;;  %s153_s25 = sshll.u32 %s1607_s24, 4  ;;  %s1695_s25 = int_to_ptr.vmem [resolvable:$true] %s153_s25 }
   0xe   : > { %s1608_s27 = smov [#allocation7]   ;;  %s1449_s5 = scalar_lea.hbm %s1967_s1, 2048 }
   0xf   : > { %p1363_p9 = pneg %p1691_p8  ;;  %s166_s28 = sshll.u32 %s1608_s27, 4  ;;  %s1706_s28 = int_to_ptr.vmem [resolvable:$true] %s166_s28 }
  0x10   : > { %p1450_p12 = scmp.ne.s32.totalorder %s1967_s1, %s1449_s5  ;;  %p1456_p5 = scmp.lt.u32.totalorder %s1449_s5, %s1967_s1 }
  0x11   : > { %p1702_p11 = pnand %p1363_p9, %p1971_p1 }
  0x13   : > { %p1451_p13 = pneg %p1702_p11 }
  0x15   : > { %p1452_p0 = pnand %p1451_p13, %p1450_p12 }
  0x17   : > { %p1453_p3 = pneg %p1452_p0 }
  0x19   : > { %p1458_p7 = pnand %p1456_p5, %p1453_p3 }
  0x1b   : > { %1461 = shalt.err (!%p1458_p7)
}
  0x1c   : > { %s1462_s10 = scalar_lea.vmem %s1695_s25, 2048  ;;  %p1470_p2 = scmp.lt.s32.totalorder %s1695_s25, %s1695_s25 }
  0x1d   : > { %p1463_p9 = scmp.ne.s32.totalorder %s1695_s25, %s1462_s10  ;;  %p1471_p12 = scmp.lt.s32.totalorder %s1462_s10, %s1462_s10 }
  0x1f   : > { %p1465_p10 = pnand %p1463_p9, %p1451_p13  ;;  %p1472_p0 = por %p1471_p12, %p1470_p2 }
  0x21   : > { %p1466_p1 = pneg %p1465_p10 }
  0x23   : > { %p1473_p6 = pnand %p1472_p0, %p1466_p1 }
  0x25   : > { %1476 = shalt.err (!%p1473_p6)
}
  0x26   : > { %s1609_s11 = smov 256   ;;  %s1610_s12 = smov 16  }
  0x27   : > { %1366 = dma.hbm_to_vmem [thread:$0]  (!%p1702_p11), %s1967_s1, 2048, %s1695_s25, [#allocation6], %s1609_s11, %s1609_s11, %s1610_s12  }
  0x28   : > { %s1477_s27 = scalar_lea.hbm %s1968_s2, 1024 }
  0x29   : > { %p1478_p2 = scmp.ne.s32.totalorder %s1968_s2, %s1477_s27  ;;  %p1484_p10 = scmp.lt.u32.totalorder %s1477_s27, %s1968_s2 }
  0x2b   : > { %p1480_p1 = pnand %p1478_p2, %p1451_p13 }
  0x2d   : > { %p1481_p6 = pneg %p1480_p1 }
  0x2f   : > { %p1486_p3 = pnand %p1484_p10, %p1481_p6 }
  0x31   : > { %1489 = shalt.err (!%p1486_p3)
}
  0x32   : > { %s1490_s25 = scalar_lea.vmem %s1706_s28, 1024  ;;  %p1498_p12 = scmp.lt.s32.totalorder %s1706_s28, %s1706_s28 }
  0x33   : > { %p1491_p5 = scmp.ne.s32.totalorder %s1706_s28, %s1490_s25  ;;  %p1499_p0 = scmp.lt.s32.totalorder %s1490_s25, %s1490_s25 }
  0x35   : > { %p1493_p7 = pnand %p1491_p5, %p1451_p13  ;;  %p1500_p2 = por %p1499_p0, %p1498_p12 }
  0x37   : > { %p1494_p9 = pneg %p1493_p7 }
  0x39   : > { %p1501_p1 = pnand %p1500_p2, %p1494_p9 }
  0x3b   : > { %1504 = shalt.err (!%p1501_p1)
}
  0x3c   : > { %s1611_s7 = smov 128   ;;  %s1612_s8 = smov 8  }
  0x3d   : > { %1369 = dma.hbm_to_vmem [thread:$0]  (!%p1702_p11), %s1968_s2, 1024, %s1706_s28, [#allocation6], %s1611_s7, %s1611_s7, %s1612_s8  }
  0x3e   : > { %s1761_s11 = sadd.s32 1, %s1605_s18   ;;  %s28_s13 = sadd.s32 1, %s1601_s17 }
  0x3f   : > { %s25_s12 = ssub.s32 %s1605_s18, %s1761_s11  ;;  %p35_p6 = scmp.ne.s32.totalorder %s1601_s17, %s1597_s16 }
  0x40   : > { %p26_p13 = scmp.eq.s32.totalorder %s25_s12, 0  ;;  %p36_p10 = scmp.eq.s32.totalorder %s1605_s18, 0 }
  0x41   : > { %p1978_p5 = scmp.eq.s32.totalorder %s1672_s19, 1  ;;  %p1380_p9 = scmp.lt.s32.totalorder %s1605_s18, 2 }
  0x42   : > { %s1770_s14 = scalar_select %p26_p13, %s1601_s17, %s28_s13  }
  0x43   : > { %p37_p3 = por %p36_p10, %p35_p6  ;;  %p1774_p7 = por %p1978_p5, %p35_p6 }
  0x44   : > { %s183_s26 = sand.u32 1, %s1601_s17   ;;  %s1214_s28 = sshll.u32 %s1605_s18, 7 }
  0x45   : > { %s1979_s20 = scalar_select %p1774_p7, 1, 0 }
  0x46   : > { %s1213_s24 = sshll.u32 %s183_s26, 3  ;;  %s1784_s30 = scalar_lea.hbm %s1966_s0, %s1214_s28 }
  0x47   : > { %s187_s5 = scalar_lea.vmem [#allocation2], %s1213_s24  ;;  %p1788_p11 = pnand %p1380_p9, %p37_p3 }
  0x48   : > { %s194_s6 = sshll.u32 %s187_s5, 4  ;;  %s184_s7 = scalar_lea.sflag [#allocation3], %s183_s26  ;;  %s1786_s6 = int_to_ptr.vmem [resolvable:$true] %s194_s6 }
  0x49   : > { %s1505_s8 = scalar_lea.hbm %s1784_s30, 128  ;;  %p1507_p0 = pneg %p1788_p11 }
  0x4a   : > { %p1506_p12 = scmp.ne.s32.totalorder %s1784_s30, %s1505_s8  ;;  %s1510_s12 = scalar_lea.hbm %s1966_s0, 256 }
  0x4b   : > { %p1511_p13 = scmp.lt.u32.totalorder %s1784_s30, %s1966_s0  ;;  %p1512_p6 = scmp.lt.u32.totalorder %s1510_s12, %s1505_s8 }
  0x4c   : > { %p1508_p2 = pnand %p1507_p0, %p1506_p12  ;;  %p1514_p3 = scmp.lt.u32.totalorder %s1505_s8, %s1784_s30 }
  0x4d   : > { %p1513_p10 = por %p1512_p6, %p1511_p13 }
  0x4e   : > { %p1509_p1 = pneg %p1508_p2 }
  0x4f   : > { %p1515_p5 = por %p1514_p3, %p1513_p10 }
  0x51   : > { %p1516_p9 = pnand %p1515_p5, %p1509_p1 }
  0x53   : > { %1519 = shalt.err (!%p1516_p9)
}
  0x54   : > { %s1520_s26 = scalar_lea.vmem %s1786_s6, 128  ;;  %s1613_s28 = smov [#allocation2]  }
  0x55   : > { %p1521_p12 = scmp.ne.s32.totalorder %s1786_s6, %s1520_s26  ;;  %s1525_s27 = sshll.u32 %s1613_s28, 4  ;;  %s1526_s27 = int_to_ptr.vmem [resolvable:$false] %s1525_s27 }
  0x56   : > { %s1527_s29 = scalar_lea.vmem %s1526_s27, 256  ;;  %p1528_p4 = scmp.lt.s32.totalorder %s1786_s6, %s1526_s27 }
  0x57   : > { %p1523_p2 = pnand %p1521_p12, %p1507_p0  ;;  %p1529_p13 = scmp.lt.s32.totalorder %s1527_s29, %s1520_s26 }
  0x59   : > { %p1524_p7 = pneg %p1523_p2  ;;  %p1530_p6 = por %p1529_p13, %p1528_p4 }
  0x5b   : > { %p1531_p10 = pnand %p1530_p6, %p1524_p7 }
  0x5d   : > { %1534 = shalt.err (!%p1531_p10)
}
  0x5e   : > { %1373 = dma.hbm_to_vmem [thread:$0]  (!%p1788_p11), %s1784_s30, 128, %s1786_s6, %s184_s7  }
  0x5f   : > { %203 = sbr.rel (%p1691_p8) target bundleno = 2513 (0x9d1), region = 36  ;;  %s1820_s5 = sand.u32 (!%p1691_p8), 1, %s1597_s16  }
  0x60   : > { %s1216_s8 = sshll.u32 (!%p1691_p8), %s1820_s5, 3  ;;  %s206_s9 = scalar_lea.sflag (!%p1691_p8), [#allocation3], %s1820_s5 }
  0x61   : > { %s1826_s10 = scalar_lea.vmem (!%p1691_p8), [#allocation2], %s1216_s8  ;;  %p1981_p4 = scmp.ne.s32.totalorder (!%p1691_p8), %s1974_s21, 0 }
  0x66   : > { %1580 = dma.done.wait (%p1981_p4), %s206_s9, 128  }
  0x67   : > { %1582 = vsyncadd (%p1981_p4), %s206_s9, 4294967168  ;;  %p1982_p7 = scmp.eq.s32.totalorder %s1672_s19, 0 }
  0x69   : > { %1584 = dma.done.wait (%p1982_p7), [#allocation6], 3072   ;;  %p1983_p8 = pmov %p1982_p7 }
  0x6a   : > { %v1614_v0 = vmov 0.0   ;;  %v244_v1 = vld [vmem:[#allocation5 + $0x8] sm:$0xff]  ;;  %v246_v2 = vld [vmem:[#allocation5 + $0x18] sm:$0xff]  ;;  %v243_v3 = vld [vmem:[#allocation5] sm:$0xff]  ;;  %vm259_vm0 = vcmask 523264   ;;  %vm1615_vm1 = vmmov 0   ;;  %v334_v29 = vlaneseq }
  0x6b   : > { %1586 = vsyncadd (%p1983_p8), [#allocation6], 4294964224  ;;  %327 = vmatprep.mubr.f32.mxu0 %v1614_v0  ;;  %1264 = vmatprep.subr.mxu1 %v1614_v0  ;;  %v1323_v4 = vpack.c.bf16 %v246_v2, %v244_v1  ;;  %v245_v5 = vld [vmem:[#allocation5 + $0x10] sm:$0xff]  ;;  %v248_v6 = vld [vmem:[#allocation5 + $0x28] sm:$0xff]  ;;  %s1616_s21 = smov 48   ;;  %s1617_s23 = smov 64  }
  0x6c   : > { %v250_v7 = vld [vmem:[#allocation5 + $0x38] sm:$0xff]  ;;  %v1325_v8 = vpack.c.bf16 %v245_v5, %v243_v3  ;;  %v247_v10 = vld [vmem:[#allocation5 + $0x20] sm:$0xff]  ;;  %v249_v11 = vld [vmem:[#allocation5 + $0x30] sm:$0xff]  ;;  %1266 = vmatprep.mubr.msk.f32.mxu1 %vm1615_vm1, %v1614_v0  ;;  %s1618_s30 = smov 112   ;;  %vm343_vm2 = vcmask 130048   ;;  %v335_v30 = vshrl.u32 %v334_v29, 7 }
  0x6d   : > { %v1327_v9 = vpack.c.bf16 %v250_v7, %v248_v6  ;;  %v252_v12 = vld [vmem:[#allocation5 + $0x48] sm:$0xff]  ;;  %1324 = vmatprep.subr.bf16.mxu0 %v1323_v4  ;;  %v254_v13 = vld [vmem:[#allocation5 + $0x58] sm:$0xff]  ;;  %v1329_v14 = vpack.c.bf16 %v249_v11, %v247_v10  ;;  %v251_v16 = vld [vmem:[#allocation5 + $0x40] sm:$0xff]  ;;  %v337_v31 = vand.u32 127, %v334_v29  ;;  %v1619_v32 = vmov -1e+30  }
  0x6e   : > { %1326 = vmatpush1.bf16.msra.mxu0 %v1325_v8  ;;  %v1331_v15 = vpack.c.bf16 %v254_v13, %v252_v12  ;;  %v253_v17 = vld [vmem:[#allocation5 + $0x50] sm:$0xff]  ;;  %v256_v18 = vld [vmem:[#allocation5 + $0x68] sm:$0xff]  ;;  %v258_v19 = vld [vmem:[#allocation5 + $0x78] sm:$0xff]  ;;  %vm418_vm4 = vcmask 64512   ;;  %s1620_s6 = smov 96   ;;  %s1621_s25 = smov 32  }
  0x6f   : > { %1328 = vmatprep.subr.bf16.mxu0 %v1327_v9  ;;  %v1333_v20 = vpack.c.bf16 %v253_v17, %v251_v16  ;;  %v1335_v21 = vpack.c.bf16 %v258_v19, %v256_v18  ;;  %v255_v22 = vld [vmem:[#allocation5 + $0x60] sm:$0xff]  ;;  %v257_v23 = vld [vmem:[#allocation5 + $0x70] sm:$0xff]  ;;  %vm338_vm3 = vcmp.le.s32.totalorder %v337_v31, %v335_v30  ;;  %s1622_s7 = smov 16   ;;  %s1623_s12 = smov 80   ;;  %v1624_v30 = vmov 0.0|0.0  }
  0x70   : > { %v1337_v24 = vpack.c.bf16 %v257_v23, %v255_v22  ;;  %v242_v25 = vld [vmem:[%s1826_s10] sm:$0xff]  ;;  %v1854_v33 = vsel %vm338_vm3, 0.0, %v1619_v32  ;;  %vm1012_vm5 = vcmask 261120   ;;  %vm1014_vm6 = vcmask 392192   ;;  %s1236_s26 = sshll.u32 %s1672_s19, 7  ;;  %s241_s28 = scalar_lea.vmem [#allocation8], %s1216_s8 }
  0x71   : > { %v1018_v29 = vld [vmem:[#allocation7 + $0x10] sm:$0xff]  ;;  %v1019_v32 = vld [vmem:[#allocation7 + $0x18] sm:$0xff]  ;;  %s1119_s27 = sshll.u32 %s241_s28, 4  ;;  %s1921_s10 = scalar_lea.hbm %s1970_s4, %s1236_s26  ;;  %s1923_s27 = int_to_ptr.vmem [resolvable:$true] %s1119_s27 }
  0x72   : > { %1330 = vmatpush1.bf16.msra.mxu0 %v1329_v14  ;;  %s1535_s19 = scalar_lea.vmem %s1923_s27, 128  ;;  %p1984_p0 = scmp.ne.s32.totalorder %s1979_s20, 0 }
  0x73   : > { %1332 = vmatprep.subr.bf16.mxu0 %v1331_v15  ;;  %p1536_p11 = scmp.ne.s32.totalorder %s1923_s27, %s1535_s19  ;;  %s1625_s8 = smov [#allocation8]  }
  0x75   : > { %p1537_p1 = pnand %p1536_p11, %p1984_p0 }
  0x76   : > { %1334 = vmatpush1.bf16.msra.mxu0 %v1333_v20 }
  0x77   : > { %1336 = vmatprep.subr.bf16.mxu0 %v1335_v21  ;;  %p1538_p3 = pneg %p1537_p1 }
  0x7a   : > { %1338 = vmatpush1.bf16.msra.mxu0 %v1337_v24 }
  0x7b   : > { %1339 = vmatprep.subr.bf16.mxu0 %v1624_v30 }
  0x7d   : > { %1220 = vmatmul.mubr.msk.f32.vlgmr.msra.gmra.mrb[0].mxu0 %vm259_vm0, %v242_v25 }
  0x7e   : > { %1320 = vmatprep.mubr.msk.f32.mxu0 %vm1615_vm1, %v1614_v0 }
 0x150   : > { %v329_v26 = vpop.f32.mrb[0].mxu0 }
 0x151   : > { %505 = vrot.lane.b32.xlu1 %v329_v26, %s1616_s21  ;;  %341 = vrot.lane.b32.xlu0 %v329_v26, %s1617_s23  ;;  %v1845_v27 = vpop.f32.mrb[1].mxu0  ;;  %s1539_s23 = sshll.u32 %s1625_s8, 4  ;;  %s1540_s23 = int_to_ptr.vmem [resolvable:$false] %s1539_s23 }
 0x152   : > { %p1542_p5 = scmp.lt.s32.totalorder %s1923_s27, %s1540_s23 }
 0x155   : > { %503 = vrot.lane.b32.xlu1 %v329_v26, %s1618_s30 }
 0x1c3   : > { %v342_v28 = vpop.permute.xlu0 %341  ;;  %v506_v41 = vpop.permute.xlu1 %505 }
 0x1c4   : > { %1265 = vmatpush3.xpose.msk.msra.mxu1 %vm343_vm2, %v342_v28  ;;  %v1017_v28 = vld [vmem:[#allocation7 + $0x8] sm:$0xff] }
 0x1c5   : > { %1269 = vmatprep.subr.mxu1 %v1614_v0 }
 0x1c7   : > { %1267 = vmatmul.mubr.msk.f32.vlgmr.msra.gmra.mrb[0].mxu1 %vm343_vm2, %v329_v26  ;;  %v504_v43 = vpop.permute.xlu1 %503 }
 0x1c8   : > { %1270 = vmatpush3.msra.mxu1 %v1845_v27  ;;  %1271 = vmatprep.mubr.msk.f32.mxu1 %vm1615_vm1, %v1614_v0 }
 0x1c9   : > { %1274 = vmatprep.subr.mxu1 %v1614_v0 }
 0x29a   : > { %v414_v34 = vpop.f32.mrb[0].mxu1 }
 0x29b   : > { %v415_v35 = vadd.f32 %v414_v34, %v1854_v33  ;;  %v1268_v36 = vpop.f32.mrb[1].mxu1  ;;  %v1020_v34 = vld [vmem:[#allocation7 + $0x20] sm:$0xff] }
 0x29d   : > { %v419_v37 = vsel %vm418_vm4, %v415_v35, -inf }
 0x29e   : > { %420 = vmax.xlane.f32.xlu0 %v419_v37  ;;  %v1022_v37 = vld [vmem:[#allocation7 + $0x30] sm:$0xff] }
 0x2b4   : > { %592 = vrot.lane.b32.xlu0 %v1845_v27, %s1618_s30  ;;  %s1541_s30 = scalar_lea.vmem %s1540_s23, 256 }
 0x2b5   : > { %p1543_p9 = scmp.lt.s32.totalorder %s1541_s30, %s1535_s19 }
 0x2b7   : > { %p1544_p12 = por %p1543_p9, %p1542_p5 }
 0x2b8   : > { %669 = vrot.lane.b32.xlu0 %v329_v26, %s1620_s6 }
 0x2b9   : > { %p1545_p2 = pnand %p1544_p12, %p1538_p3 }
 0x32b   : > { %v421_v38 = vpop.xlane.xlu0 %420 }
 0x32c   : > { %v422_v39 = vsub.f32 %v415_v35, %v421_v38  ;;  %v1021_v35 = vld [vmem:[#allocation7 + $0x28] sm:$0xff]  ;;  %v1023_v38 = vld [vmem:[#allocation7 + $0x38] sm:$0xff] }
 0x32d   : > { %v1346_v36 = vpack.c.bf16 %v1021_v35, %v1020_v34 }
 0x32e   : > { %v423_v40 = vmul.f32 1.442695, %v422_v39  ;;  %v1349_v39 = vpack.c.bf16 %v1023_v38, %v1022_v37 }
 0x32f   : > { %v593_v44 = vpop.permute.xlu0 %592 }
 0x330   : > { %1433 = vpow2.f32 %v423_v40 }
 0x333   : > { %v670_v56 = vpop.permute.xlu0 %669 }
 0x33a   : > { %v1859_v42 = vpop.eup %1433 }
 0x33b   : > { %1272 = vmatmul.mubr.msk.f32.vlgmr.msra.gmra.mrb[2].mxu1 %vm418_vm4, %v1859_v42  ;;  %v425_v16 = vsel %vm418_vm4, %v1859_v42, 0.0 }
 0x33c   : > { %1275 = vmatpush3.xpose.msk.msra.mxu1 %vm343_vm2, %v506_v41  ;;  %1276 = vmatprep.mubr.msk.f32.mxu1 %vm1615_vm1, %v1614_v0 }
 0x33d   : > { %1279 = vmatprep.subr.mxu1 %v1614_v0 }
 0x33f   : > { %1277 = vmatmul.mubr.msk.f32.vlgmr.msra.gmra.mrb[4].mxu1 %vm343_vm2, %v504_v43 }
 0x340   : > { %1280 = vmatpush3.msra.mxu1 %v593_v44  ;;  %1281 = vmatprep.mubr.msk.f32.mxu1 %vm1615_vm1, %v1614_v0 }
 0x341   : > { %1284 = vmatprep.subr.mxu1 %v1614_v0 }
 0x40e   : > { %v1871_v45 = vpop.f32.mrb[2].mxu1 }
 0x40f   : > { %v1273_v46 = vpop.f32.mrb[3].mxu1 }
 0x412   : > { %v577_v47 = vpop.f32.mrb[4].mxu1 }
 0x413   : > { %v578_v48 = vadd.f32 %v577_v47, %v1854_v33  ;;  %v1278_v49 = vpop.f32.mrb[5].mxu1 }
 0x415   : > { %v581_v50 = vsel %vm418_vm4, %v578_v48, -inf }
 0x416   : > { %582 = vmax.xlane.f32.xlu1 %v581_v50 }
 0x427   : > { %671 = vrot.lane.b32.xlu1 %v329_v26, %s1621_s25 }
 0x42b   : > { %757 = vrot.lane.b32.xlu1 %v1845_v27, %s1620_s6 }
 0x42f   : > { %836 = vrot.lane.b32.xlu1 %v329_v26, %s1622_s7 }
 0x433   : > { %834 = vrot.lane.b32.xlu1 %v329_v26, %s1623_s12 }
 0x4a3   : > { %v583_v51 = vpop.xlane.xlu1 %582 }
 0x4a4   : > { %v584_v52 = vsub.f32 %v578_v48, %v583_v51 }
 0x4a6   : > { %v585_v53 = vmul.f32 1.442695, %v584_v52 }
 0x4a7   : > { %v672_v54 = vpop.permute.xlu1 %671 }
 0x4a8   : > { %1435 = vpow2.f32 %v585_v53 }
 0x4ab   : > { %v758_v57 = vpop.permute.xlu1 %757 }
 0x4af   : > { %v837_v4 = vpop.permute.xlu1 %836 }
 0x4b2   : > { %v1436_v55 = vpop.eup %1435 }
 0x4b3   : > { %1282 = vmatmul.mubr.msk.f32.vlgmr.msra.gmra.mrb[6].mxu1 %vm418_vm4, %v1436_v55  ;;  %v835_v6 = vpop.permute.xlu1 %834  ;;  %v587_v14 = vsel %vm418_vm4, %v1436_v55, 0.0  ;;  %v1233_v55 = vld [vmem:[%s1969_s3] ss:$0 sm:$0xff] }
 0x4b4   : > { %1285 = vmatpush3.xpose.msk.msra.mxu1 %vm343_vm2, %v672_v54  ;;  %1286 = vmatprep.mubr.msk.f32.mxu1 %vm1615_vm1, %v1614_v0 }
 0x4b5   : > { %1289 = vmatprep.subr.mxu1 %v1614_v0 }
 0x4b7   : > { %1287 = vmatmul.mubr.msk.f32.vlgmr.msra.gmra.mrb[8].mxu1 %vm343_vm2, %v670_v56 }
 0x4b8   : > { %1290 = vmatpush3.msra.mxu1 %v758_v57  ;;  %1291 = vmatprep.mubr.msk.f32.mxu1 %vm1615_vm1, %v1614_v0 }
 0x4b9   : > { %1294 = vmatprep.subr.mxu1 %v1614_v0 }
 0x586   : > { %v664_v58 = vpop.f32.mrb[6].mxu1 }
 0x587   : > { %v1283_v59 = vpop.f32.mrb[7].mxu1 }
 0x58a   : > { %v743_v60 = vpop.f32.mrb[8].mxu1 }
 0x58b   : > { %v744_v61 = vadd.f32 %v743_v60, %v1854_v33  ;;  %v1288_v62 = vpop.f32.mrb[9].mxu1 }
 0x58d   : > { %v747_v63 = vsel %vm418_vm4, %v744_v61, -inf }
 0x58e   : > { %748 = vmax.xlane.f32.xlu0 %v747_v63 }
 0x5a4   : > { %922 = vrot.lane.b32.xlu0 %v1845_v27, %s1623_s12  ;;  %v1016_v27 = vld [vmem:[#allocation7] sm:$0xff] }
 0x5a5   : > { %v1340_v31 = vpack.c.bf16 %v1017_v28, %v1016_v27 }
 0x5a7   : > { %1341 = vmatpush3.bf16.msra.mxu0 %v1340_v31 }
 0x5a8   : > { %1342 = vmatprep.subr.bf16.mxu0 %v1624_v30 }
 0x61b   : > { %v749_v1 = vpop.xlane.xlu0 %748 }
 0x61c   : > { %v750_v2 = vsub.f32 %v744_v61, %v749_v1 }
 0x61e   : > { %v751_v3 = vmul.f32 1.442695, %v750_v2 }
 0x61f   : > { %v923_v7 = vpop.permute.xlu0 %922 }
 0x620   : > { %1437 = vpow2.f32 %v751_v3 }
 0x62a   : > { %v1438_v5 = vpop.eup %1437 }
 0x62b   : > { %1292 = vmatmul.mubr.msk.f32.vlgmr.msra.gmra.mrb[10].mxu1 %vm418_vm4, %v1438_v5  ;;  %v753_v15 = vsel %vm418_vm4, %v1438_v5, 0.0 }
 0x62c   : > { %1295 = vmatpush3.xpose.msk.msra.mxu1 %vm343_vm2, %v837_v4  ;;  %1296 = vmatprep.mubr.msk.f32.mxu1 %vm1615_vm1, %v1614_v0 }
 0x62d   : > { %1299 = vmatprep.subr.mxu1 %v1614_v0 }
 0x62f   : > { %1297 = vmatmul.mubr.msk.f32.vlgmr.msra.gmra.mrb[12].mxu1 %vm343_vm2, %v835_v6 }
 0x630   : > { %1300 = vmatpush3.msra.mxu1 %v923_v7  ;;  %1301 = vmatprep.mubr.msk.f32.mxu1 %vm1615_vm1, %v1614_v0 }
 0x6fe   : > { %v829_v8 = vpop.f32.mrb[10].mxu1 }
 0x6ff   : > { %v1293_v9 = vpop.f32.mrb[11].mxu1 }
 0x702   : > { %v908_v10 = vpop.f32.mrb[12].mxu1 }
 0x703   : > { %v909_v11 = vadd.f32 %v908_v10, %v1854_v33  ;;  %v1298_v12 = vpop.f32.mrb[13].mxu1  ;;  %v1343_v33 = vpack.c.bf16 %v1019_v32, %v1018_v29 }
 0x705   : > { %v912_v13 = vsel %vm418_vm4, %v909_v11, -inf  ;;  %1344 = vmatpush3.bf16.msra.mxu0 %v1343_v33 }
 0x706   : > { %913 = vmax.xlane.f32.xlu1 %v912_v13  ;;  %1345 = vmatprep.subr.bf16.mxu0 %v1624_v30 }
 0x709   : > { %1347 = vmatpush3.bf16.msra.mxu0 %v1346_v36 }
 0x70a   : > { %588 = vadd.xlane.f32.xlu1 %v587_v14  ;;  %1348 = vmatprep.subr.bf16.mxu0 %v1624_v30 }
 0x70d   : > { %1350 = vmatpush3.bf16.msra.mxu0 %v1349_v39 }
 0x70e   : > { %754 = vadd.xlane.f32.xlu1 %v753_v15 }
 0x712   : > { %426 = vadd.xlane.f32.xlu1 %v425_v16 }
 0x793   : > { %v914_v0 = vpop.xlane.xlu1 %913 }
 0x794   : > { %v915_v17 = vsub.f32 %v909_v11, %v914_v0 }
 0x796   : > { %v916_v18 = vmul.f32 1.442695, %v915_v17 }
 0x797   : > { %v589_v19 = vpop.xlane.xlu1 %588 }
 0x798   : > { %1439 = vpow2.f32 %v916_v18 }
 0x799   : > { %1441 = vrcp.f32 %v589_v19 }
 0x79b   : > { %v755_v20 = vpop.xlane.xlu1 %754 }
 0x79c   : > { %1443 = vrcp.f32 %v755_v20 }
 0x79f   : > { %v427_v46 = vpop.xlane.xlu1 %426 }
 0x7a2   : > { %v1440_v21 = vpop.eup %1439 }
 0x7a3   : > { %v1442_v22 = vpop.eup %1441  ;;  %1302 = vmatmul.mubr.msk.f32.vlgmr.msra.gmra.mrb[14].mxu1 %vm418_vm4, %v1440_v21  ;;  %v918_v23 = vsel %vm418_vm4, %v1440_v21, 0.0 }
 0x7a4   : > { %919 = vadd.xlane.f32.xlu0 %v918_v23  ;;  %v668_v24 = vmul.f32 %v1442_v22, %v664_v58 }
 0x7a6   : > { %v1444_v25 = vpop.eup %1443  ;;  %1000 = vrot.lane.b32.xlu1 %v668_v24, %s1622_s7 }
 0x7a7   : > { %v833_v26 = vmul.f32 %v1444_v25, %v829_v8 }
 0x7aa   : > { %1004 = vrot.lane.b32.xlu1 %v833_v26, %s1621_s25 }
 0x818   : > { %v1001_v47 = vpop.permute.xlu1 %1000 }
 0x81c   : > { %v1005_v49 = vpop.permute.xlu1 %1004 }
 0x831   : > { %v920_v40 = vpop.xlane.xlu0 %919 }
 0x832   : > { %1445 = vrcp.f32 %v920_v40 }
 0x833   : > { %1447 = vrcp.f32 %v427_v46 }
 0x83c   : > { %v1446_v41 = vpop.eup %1445 }
 0x83d   : > { %v1448_v48 = vpop.eup %1447 }
 0x83e   : > { %v502_v50 = vmul.f32 %v1448_v48, %v1871_v45 }
 0x840   : > { %v1011_v51 = vsel %vm343_vm2, %v502_v50, %v1001_v47 }
 0x841   : > { %v1013_v52 = vsel %vm1012_vm5, %v1011_v51, %v1005_v49 }
 0x876   : > { %v994_v42 = vpop.f32.mrb[14].mxu1 }
 0x877   : > { %v998_v43 = vmul.f32 %v1446_v41, %v994_v42  ;;  %v1303_v44 = vpop.f32.mrb[15].mxu1 }
 0x879   : > { %1008 = vrot.lane.b32.xlu1 %v998_v43, %s1616_s21  ;;  %s1106_s21 = scalar_lea.sflag [#allocation4], %s1820_s5 }
 0x8eb   : > { %v1009_v53 = vpop.permute.xlu1 %1008 }
 0x8ec   : > { %v1015_v54 = vsel %vm1014_vm6, %v1013_v52, %v1009_v53 }
 0x8ed   : > { %1321 = vmatmul.mubr.msk.f32.vlgmr.msra.gmra.mrb[2].mxu0 %vm259_vm0, %v1015_v54 }
 0x9c0   : > { %v1100_v45 = vpop.f32.mrb[2].mxu0 }
 0x9c1   : > { %v1101_v56 = vadd.f32 %v1233_v55, %v1100_v45  ;;  %v1322_v57 = vpop.f32.mrb[3].mxu0 }
 0x9c3   : > { %1104 = vst.msk [vmem:[%s241_s28] sm:$0xff] %vm259_vm0, %v1101_v56 }
 0x9c4   : > { %1548 = shalt.err (!%p1545_p2)
}
 0x9c5   : > { %s1549_s5 = scalar_lea.hbm %s1921_s10, 128  ;;  %s1553_s7 = scalar_lea.hbm %s1970_s4, 256 }
 0x9c6   : > { %p1550_p13 = scmp.ne.s32.totalorder %s1921_s10, %s1549_s5  ;;  %p1554_p4 = scmp.lt.u32.totalorder %s1921_s10, %s1970_s4 }
 0x9c7   : > { %p1555_p7 = scmp.lt.u32.totalorder %s1553_s7, %s1549_s5  ;;  %p1557_p11 = scmp.lt.u32.totalorder %s1549_s5, %s1921_s10 }
 0x9c8   : > { %p1551_p6 = pnand %p1550_p13, %p1984_p0 }
 0x9c9   : > { %p1556_p8 = por %p1555_p7, %p1554_p4 }
 0x9ca   : > { %p1552_p10 = pneg %p1551_p6 }
 0x9cb   : > { %p1558_p1 = por %p1557_p11, %p1556_p8 }
 0x9cd   : > { %p1559_p3 = pnand %p1558_p1, %p1552_p10 }
 0x9cf   : > { %1562 = shalt.err (!%p1559_p3)
}
 0x9d0   : > { %1361 = dma.vmem_to_hbm [thread:$0]  (%p1984_p0), %s1923_s27, 128, %s1921_s10, %s1106_s21  }
 0x9d1 PF: > { %s1131_s24 = sand.u32 1, %s1593_s15   ;;  %p1985_p5 = scmp.ne.s32.totalorder %s1975_s22, 0 }
 0x9d2   : > { %p1986_p9 = scmp.ge.s32.totalorder %s1605_s18, 2  ;;  %s1132_s26 = scalar_lea.sflag [#allocation4], %s1131_s24 }
 0x9d4   : > { %p1375_p12 = pnand %p1986_p9, %p1985_p5 }
 0x9d6   : > { %1588 = dma.done.wait (!%p1375_p12), %s1132_s26, 128  }
 0x9d7   : > { %1590 = vsyncadd (!%p1375_p12), %s1132_s26, 4294967168  ;;  %p18_p2 = scmp.ge.s32.totalorder %s1761_s11, 4   ;;  %s1987_s15 = smov %s1597_s16 }
 0x9d8   : > { %s1988_s16 = smov %s1601_s17  ;;  %s1989_s17 = smov %s1770_s14 }
 0x9d9   : > { %s1990_s18 = smov %s1761_s11  ;;  %20 = sbr.rel (!%p18_p2) target bundleno = 6 (0x6), region = 89 }
 0x9e0   :  { %1137 = vsyncpa [#allocation3], 1 }
 0x9e1   :  { %1139 = vsyncpa [#allocation3 + $0x1], 1 }
 0x9e2   :  { %1140 = vsyncpa [#allocation6], 1 }
 0x9e3   :  { %1141 = vsyncpa [#allocation4], 1 }
 0x9e4   :  { %1143 = vsyncpa [#allocation4 + $0x1], 1 }

</bundles_post_ra>
